<compile_context>
chip_gen: v7x
topology: tpu7x:2x2x1
jax: 0.10.0
libtpu: 0.0.40
codegen_flags: <defaults>
</compile_context>

<pallas_src>
import numpy as np
import jax
import jax.numpy as jnp
from jax.experimental import pallas as pl
from jax.experimental.pallas import tpu as pltpu

LN_EPS = 1e-5                 # torch.nn.LayerNorm default eps
K_PAD = 128                   # lane-dense padding for the segmentation head
INV_SQRT2 = 0.7071067811865476


def _layernorm(x, gamma, beta):
    mu = jnp.mean(x, axis=-1, keepdims=True)
    var = jnp.mean((x - mu) ** 2, axis=-1, keepdims=True)
    return (x - mu) * jax.lax.rsqrt(var + LN_EPS) * gamma + beta


def _gelu(x):
    # exact erf-based GELU == torch.nn.GELU(approximate='none')
    return 0.5 * x * (1.0 + jax.lax.erf(x * INV_SQRT2))


# ---------------------------------------------------------------------------
# Fused kernel: one grid step = (one batch element, one Mixer block).
# ---------------------------------------------------------------------------
def fused_mixer_kernel(p_ref, we_ref, pe_ref,
                       g_ref, b_ref,
                       w1t_ref, b1t_ref, w2t_ref, b2t_ref,
                       w1c_ref, b1c_ref, w2c_ref, b2c_ref,
                       hg_ref, hb_ref, wc_ref, bc_ref,
                       o_ref, act_ref):
    blk = pl.program_id(1)
    last = pl.num_programs(1) - 1

    # --- patch embedding fused in: only on the first block step per batch ---
    @pl.when(blk == 0)
    def _():
        act_ref[...] = (jnp.dot(p_ref[0], we_ref[...],
                                preferred_element_type=jnp.float32)
                        + pe_ref[0])

    x = act_ref[...]                      # (N, D) activation, resident in VMEM
    gamma = g_ref[0]                      # (1, D) — shared by both pre-norms
    beta = b_ref[0]

    # --- token-mixing branch (transposed weights; activation never .T'd) ---
    ln = _layernorm(x, gamma, beta)                                       # (N, D)
    h = _gelu(jnp.dot(w1t_ref[0], ln,
                      preferred_element_type=jnp.float32) + b1t_ref[0])   # (Th, D)
    tok = jnp.dot(w2t_ref[0], h,
                  preferred_element_type=jnp.float32) + b2t_ref[0]        # (N, D)
    out = x + tok                                                         # residual

    # --- channel-mixing branch ---
    ln2 = _layernorm(out, gamma, beta)
    h2 = _gelu(jnp.dot(ln2, w1c_ref[0],
                       preferred_element_type=jnp.float32) + b1c_ref[0])  # (N, Ch)
    ch = jnp.dot(h2, w2c_ref[0],
                 preferred_element_type=jnp.float32) + b2c_ref[0]         # (N, D)
    new = out + ch                                                        # residual

    # Only store the carried activation if another block will consume it;
    # on the last block the head reads `new` directly from registers.
    @pl.when(blk < last)
    def _():
        act_ref[...] = new

    # --- head: final LayerNorm + 1x1 conv as matmul; lane-dense (K_PAD) out ---
    @pl.when(blk == last)
    def _():
        ln3 = _layernorm(new, hg_ref[...], hb_ref[...])
        o_ref[0] = (jnp.dot(ln3, wc_ref[...],
                            preferred_element_type=jnp.float32)
                    + bc_ref[...]).astype(o_ref.dtype)


# ---------------------------------------------------------------------------
# Wrapper-side layout plumbing.
# TODO(synk): the real MixerSegformer runs an arbitrary frozen backbone on each
# patch (backbone.decode_head.backbone_output); here the per-patch embedding is
# a deterministic linear projection on the flattened patch pixels.
# ---------------------------------------------------------------------------
def _extract_patches(images, patch_size, window_size):
    B, C, H, W = images.shape
    x = images.reshape(B, C, window_size, patch_size, window_size, patch_size)
    x = x.transpose(0, 2, 4, 1, 3, 5)          # (B, wr, wc, C, P, P)
    return x.reshape(B, window_size * window_size, C * patch_size * patch_size)


def mixer_segformer_forward(x, params, patch_size, window_size, num_classes):
    B, C, _, _ = x.shape
    N = window_size * window_size
    CPP = C * patch_size * patch_size
    D = params["w_embed"].shape[1]
    blocks = params["blocks"]
    L = len(blocks)
    Th = blocks[0][2].shape[1]
    Ch = blocks[0][6].shape[1]

    patches = _extract_patches(x, patch_size, window_size)              # (B, N, CPP)

    # Stack per-block weights along a leading block axis; pre-transpose the
    # token-mixing weights so the kernel needs no activation transposes.
    gs   = jnp.stack([b[0] for b in blocks])                            # (L, 1, D)
    bs   = jnp.stack([b[1] for b in blocks])                            # (L, 1, D)
    w1tT = jnp.stack([b[2].T for b in blocks])                          # (L, Th, N)
    b1tC = jnp.stack([b[3].reshape(-1, 1) for b in blocks])             # (L, Th, 1)
    w2tT = jnp.stack([b[4].T for b in blocks])                          # (L, N, Th)
    b2tC = jnp.stack([b[5].reshape(-1, 1) for b in blocks])             # (L, N, 1)
    w1c  = jnp.stack([b[6] for b in blocks])                            # (L, D, Ch)
    b1c  = jnp.stack([b[7] for b in blocks])                            # (L, 1, Ch)
    w2c  = jnp.stack([b[8] for b in blocks])                            # (L, Ch, D)
    b2c  = jnp.stack([b[9] for b in blocks])                            # (L, 1, D)

    hg, hb, wc, bc = params["head"]
    wc_pad = jnp.zeros((D, K_PAD), wc.dtype).at[:, :num_classes].set(wc)
    bc_pad = jnp.zeros((1, K_PAD), bc.dtype).at[:, :num_classes].set(bc)

    blk_map = lambda b, l: (l, 0, 0)
    y = pl.pallas_call(
        fused_mixer_kernel,
        out_shape=jax.ShapeDtypeStruct((B, N, K_PAD), jnp.float32),
        grid_spec=pltpu.PrefetchScalarGridSpec(
            num_scalar_prefetch=0,
            grid=(B, L),
            in_specs=[
                pl.BlockSpec((1, N, CPP), lambda b, l: (b, 0, 0)),      # patches
                pl.BlockSpec((CPP, D),    lambda b, l: (0, 0)),         # w_embed
                pl.BlockSpec((1, N, D),   lambda b, l: (0, 0, 0)),      # pos_emb
                pl.BlockSpec((1, 1, D),   blk_map),                     # gamma
                pl.BlockSpec((1, 1, D),   blk_map),                     # beta
                pl.BlockSpec((1, Th, N),  blk_map),                     # w1t^T
                pl.BlockSpec((1, Th, 1),  blk_map),                     # b1t (column)
                pl.BlockSpec((1, N, Th),  blk_map),                     # w2t^T
                pl.BlockSpec((1, N, 1),   blk_map),                     # b2t (column)
                pl.BlockSpec((1, D, Ch),  blk_map),                     # w1c
                pl.BlockSpec((1, 1, Ch),  blk_map),                     # b1c
                pl.BlockSpec((1, Ch, D),  blk_map),                     # w2c
                pl.BlockSpec((1, 1, D),   blk_map),                     # b2c
                pl.BlockSpec((1, D),      lambda b, l: (0, 0)),         # head gamma
                pl.BlockSpec((1, D),      lambda b, l: (0, 0)),         # head beta
                pl.BlockSpec((D, K_PAD),  lambda b, l: (0, 0)),         # head W (padded)
                pl.BlockSpec((1, K_PAD),  lambda b, l: (0, 0)),         # head b (padded)
            ],
            out_specs=pl.BlockSpec((1, N, K_PAD), lambda b, l: (b, 0, 0)),
            scratch_shapes=[pltpu.VMEM((N, D), jnp.float32)],           # resident act
        ),
        compiler_params=pltpu.CompilerParams(
            dimension_semantics=("parallel", "arbitrary")),
    )(patches, params["w_embed"], params["pos_emb"],
      gs, bs, w1tT, b1tC, w2tT, b2tC, w1c, b1c, w2c, b2c,
      hg, hb, wc_pad, bc_pad)

    y = y[..., :num_classes]                                            # (B, N, K)
    result = y.reshape(B, window_size, window_size,
                       num_classes).transpose(0, 3, 1, 2)               # NCHW
    return [None, result]                                               # matches PyTorch


# ---------------------------------------------------------------------------
# Pure-jnp reference (same math, original weight layout) for a sanity check.
# ---------------------------------------------------------------------------
def reference_forward(x, params, patch_size, window_size, num_classes):
    patches = _extract_patches(x, patch_size, window_size)
    out = patches @ params["w_embed"] + params["pos_emb"]
    for (g, b, w1t, b1t, w2t, b2t, w1c, b1c, w2c, b2c) in params["blocks"]:
        ln = _layernorm(out, g, b)
        t = jnp.swapaxes(ln, 1, 2)
        t = jnp.swapaxes(_gelu(t @ w1t + b1t) @ w2t + b2t, 1, 2)
        out = out + t
        ln2 = _layernorm(out, g, b)
        out = out + (_gelu(ln2 @ w1c + b1c) @ w2c + b2c)
    g, b, wc, bc = params["head"]
    y = _layernorm(out, g, b) @ wc + bc
    B = x.shape[0]
    return y.reshape(B, window_size, window_size, num_classes).transpose(0, 3, 1, 2)


def init_params(key, C, patch_size, n_patches, D, token_hidden, channel_hidden,
                num_classes, num_blocks):
    def nrm(k, shape, scale=0.02):
        return scale * jax.random.normal(k, shape, jnp.float32)

    # 1 (embed) + 8 per block + 2 (head) random tensors
    keys = iter(jax.random.split(key, 3 + 8 * num_blocks))
    params = {}
    params["w_embed"] = nrm(next(keys), (C * patch_size * patch_size, D))
    params["pos_emb"] = jnp.zeros((1, n_patches, D), jnp.float32)  # torch.zeros init

    blocks = []
    for _ in range(num_blocks):
        gamma = jnp.ones((1, D), jnp.float32)
        beta = jnp.zeros((1, D), jnp.float32)
        w1t = nrm(next(keys), (n_patches, token_hidden))
        b1t = nrm(next(keys), (1, token_hidden))
        w2t = nrm(next(keys), (token_hidden, n_patches))
        b2t = nrm(next(keys), (1, n_patches))
        w1c = nrm(next(keys), (D, channel_hidden))
        b1c = nrm(next(keys), (1, channel_hidden))
        w2c = nrm(next(keys), (channel_hidden, D))
        b2c = nrm(next(keys), (1, D))
        blocks.append((gamma, beta, w1t, b1t, w2t, b2t, w1c, b1c, w2c, b2c))
    params["blocks"] = blocks

    g1 = jnp.ones((1, D), jnp.float32)
    b1 = jnp.zeros((1, D), jnp.float32)
    wc = nrm(next(keys), (D, num_classes))   # Conv2d(D, K, 1) weight, transposed
    bc = nrm(next(keys), (1, num_classes))
    params["head"] = (g1, b1, wc, bc)
    return params


if __name__ == "__main__":
    # Small, module-consistent shapes.
    B, C, HW = 2, 4, 16
    patch_size = 4
    window = HW // patch_size          # window_size = 4
    n_patches = window * window        # 16
    D = 32                             # backbone.embedding_dim
    token_hidden = 16
    channel_hidden = 64
    num_classes = 5
    num_blocks = 2

    key = jax.random.PRNGKey(0)
    k_param, k_x = jax.random.split(key)
    params = init_params(k_param, C, patch_size, n_patches, D,
                         token_hidden, channel_hidden, num_classes, num_blocks)
    x = jax.random.normal(k_x, (B, C, HW, HW), jnp.float32)

    none_out, result = mixer_segformer_forward(x, params, patch_size, window,
                                               num_classes)
    result = jax.block_until_ready(result)
    assert none_out is None
    assert result.shape == (B, num_classes, window, window)

    ref = jax.block_until_ready(
        reference_forward(x, params, patch_size, window, num_classes))
    np.testing.assert_allclose(np.asarray(result), np.asarray(ref),
                               rtol=2e-2, atol=2e-2)

    print("KERNEL_OK")
</pallas_src>

<mosaic_0001>
module attributes {stable_mosaic.version = 11 : i64} {
  func.func @fused_mixer_kernel(%arg0: i32, %arg1: i32, %arg2: memref<1x16x64xf32, #tpu.memory_space<vmem>>, %arg3: memref<64x32xf32, #tpu.memory_space<vmem>>, %arg4: memref<1x16x32xf32, #tpu.memory_space<vmem>>, %arg5: memref<1x1x32xf32, #tpu.memory_space<vmem>>, %arg6: memref<1x1x32xf32, #tpu.memory_space<vmem>>, %arg7: memref<1x16x16xf32, #tpu.memory_space<vmem>>, %arg8: memref<1x16x1xf32, #tpu.memory_space<vmem>>, %arg9: memref<1x16x16xf32, #tpu.memory_space<vmem>>, %arg10: memref<1x16x1xf32, #tpu.memory_space<vmem>>, %arg11: memref<1x32x64xf32, #tpu.memory_space<vmem>>, %arg12: memref<1x1x64xf32, #tpu.memory_space<vmem>>, %arg13: memref<1x64x32xf32, #tpu.memory_space<vmem>>, %arg14: memref<1x1x32xf32, #tpu.memory_space<vmem>>, %arg15: memref<1x32xf32, #tpu.memory_space<vmem>>, %arg16: memref<1x32xf32, #tpu.memory_space<vmem>>, %arg17: memref<32x128xf32, #tpu.memory_space<vmem>>, %arg18: memref<1x128xf32, #tpu.memory_space<vmem>>, %arg19: memref<1x16x128xf32, #tpu.memory_space<vmem>>, %arg20: memref<16x32xf32, #tpu.memory_space<vmem>>) attributes {dimension_semantics = [#tpu.dimension_semantics<parallel>, #tpu.dimension_semantics<arbitrary>], iteration_bounds = array<i64: 2, 2>, scalar_prefetch = 0 : i64, scratch_operands = 1 : i64, tpu.core_type = #tpu.core_type<tc>, window_params = [{transform_indices = @transform_0, window_bounds = array<i64: 1, 16, 64>}, {pipeline_mode = #tpu.pipeline_mode<synchronous>, transform_indices = @transform_1, window_bounds = array<i64: 64, 32>}, {pipeline_mode = #tpu.pipeline_mode<synchronous>, transform_indices = @transform_2, window_bounds = array<i64: 1, 16, 32>}, {transform_indices = @transform_3, window_bounds = array<i64: 1, 1, 32>}, {transform_indices = @transform_4, window_bounds = array<i64: 1, 1, 32>}, {transform_indices = @transform_5, window_bounds = array<i64: 1, 16, 16>}, {transform_indices = @transform_6, window_bounds = array<i64: 1, 16, 1>}, {transform_indices = @transform_7, window_bounds = array<i64: 1, 16, 16>}, {transform_indices = @transform_8, window_bounds = array<i64: 1, 16, 1>}, {transform_indices = @transform_9, window_bounds = array<i64: 1, 32, 64>}, {transform_indices = @transform_10, window_bounds = array<i64: 1, 1, 64>}, {transform_indices = @transform_11, window_bounds = array<i64: 1, 64, 32>}, {transform_indices = @transform_12, window_bounds = array<i64: 1, 1, 32>}, {pipeline_mode = #tpu.pipeline_mode<synchronous>, transform_indices = @transform_13, window_bounds = array<i64: 1, 32>}, {pipeline_mode = #tpu.pipeline_mode<synchronous>, transform_indices = @transform_14, window_bounds = array<i64: 1, 32>}, {pipeline_mode = #tpu.pipeline_mode<synchronous>, transform_indices = @transform_15, window_bounds = array<i64: 32, 128>}, {pipeline_mode = #tpu.pipeline_mode<synchronous>, transform_indices = @transform_16, window_bounds = array<i64: 1, 128>}, {transform_indices = @transform_17, window_bounds = array<i64: 1, 16, 128>}]} {
    %c0_i32 = arith.constant 0 : i32
    %0 = arith.cmpi eq, %arg1, %c0_i32 : i32
    %1 = arith.extui %0 : i1 to i32
    %c0_i32_0 = arith.constant 0 : i32
    %2 = arith.cmpi ne, %1, %c0_i32_0 : i32
    scf.if %2 {
      %c0_54 = arith.constant 0 : index
      %c0_55 = arith.constant 0 : index
      %c0_56 = arith.constant 0 : index
      %104 = vector.load %arg2[%c0_54, %c0_55, %c0_56] : memref<1x16x64xf32, #tpu.memory_space<vmem>>, vector<1x16x64xf32>
      %105 = vector.shape_cast %104 : vector<1x16x64xf32> to vector<16x64xf32>
      %c0_57 = arith.constant 0 : index
      %c0_58 = arith.constant 0 : index
      %106 = vector.load %arg3[%c0_57, %c0_58] : memref<64x32xf32, #tpu.memory_space<vmem>>, vector<64x32xf32>
      %cst_59 = arith.constant dense<0.000000e+00> : vector<16x32xf32>
      %107 = tpu.matmul %105, %106, %cst_59 {dimension_numbers = #tpu.dot_dimension_numbers<[1], [0], [0], [1], [0, 0, 1, 1], [], []>} : vector<16x64xf32>, vector<64x32xf32>, vector<16x32xf32> -> vector<16x32xf32>
      %c0_60 = arith.constant 0 : index
      %c0_61 = arith.constant 0 : index
      %c0_62 = arith.constant 0 : index
      %108 = vector.load %arg4[%c0_60, %c0_61, %c0_62] : memref<1x16x32xf32, #tpu.memory_space<vmem>>, vector<1x16x32xf32>
      %109 = vector.shape_cast %108 : vector<1x16x32xf32> to vector<16x32xf32>
      %110 = arith.addf %107, %109 : vector<16x32xf32>
      %c0_63 = arith.constant 0 : index
      %c0_64 = arith.constant 0 : index
      %111 = vector.load %arg20[%c0_63, %c0_64] : memref<16x32xf32, #tpu.memory_space<vmem>>, vector<16x32xf32>
      tpu.vector_store %arg20[%c0_63, %c0_64], %110 {strides = array<i32>} : memref<16x32xf32, #tpu.memory_space<vmem>>, vector<16x32xf32>,
    } else {
    }
    %c0 = arith.constant 0 : index
    %c0_1 = arith.constant 0 : index
    %3 = vector.load %arg20[%c0, %c0_1] : memref<16x32xf32, #tpu.memory_space<vmem>>, vector<16x32xf32>
    %c0_2 = arith.constant 0 : index
    %c0_3 = arith.constant 0 : index
    %c0_4 = arith.constant 0 : index
    %4 = vector.load %arg5[%c0_2, %c0_3, %c0_4] : memref<1x1x32xf32, #tpu.memory_space<vmem>>, vector<1x1x32xf32>
    %5 = vector.shape_cast %4 : vector<1x1x32xf32> to vector<1x32xf32>
    %c0_5 = arith.constant 0 : index
    %c0_6 = arith.constant 0 : index
    %c0_7 = arith.constant 0 : index
    %6 = vector.load %arg6[%c0_5, %c0_6, %c0_7] : memref<1x1x32xf32, #tpu.memory_space<vmem>>, vector<1x1x32xf32>
    %7 = vector.shape_cast %6 : vector<1x1x32xf32> to vector<1x32xf32>
    %cst = arith.constant dense<0.000000e+00> : vector<16xf32>
    %8 = vector.multi_reduction <add>, %3, %cst [1] : vector<16x32xf32> to vector<16xf32>
    %9 = vector.shape_cast %8 : vector<16xf32> to vector<16x1xf32>
    %cst_8 = arith.constant 3.200000e+01 : f32
    %10 = vector.broadcast %cst_8 : f32 to vector<16x1xf32>
    %11 = arith.divf %9, %10 : vector<16x1xf32>
    %12 = vector.broadcast %11 : vector<16x1xf32> to vector<16x32xf32>
    %13 = arith.subf %3, %12 : vector<16x32xf32>
    %14 = arith.mulf %13, %13 : vector<16x32xf32>
    %cst_9 = arith.constant dense<0.000000e+00> : vector<16xf32>
    %15 = vector.multi_reduction <add>, %14, %cst_9 [1] : vector<16x32xf32> to vector<16xf32>
    %16 = vector.shape_cast %15 : vector<16xf32> to vector<16x1xf32>
    %cst_10 = arith.constant 3.200000e+01 : f32
    %17 = vector.broadcast %cst_10 : f32 to vector<16x1xf32>
    %18 = arith.divf %16, %17 : vector<16x1xf32>
    %19 = vector.broadcast %11 : vector<16x1xf32> to vector<16x32xf32>
    %20 = arith.subf %3, %19 : vector<16x32xf32>
    %cst_11 = arith.constant 9.99999974E-6 : f32
    %21 = vector.broadcast %cst_11 : f32 to vector<16x1xf32>
    %22 = arith.addf %18, %21 : vector<16x1xf32>
    %23 = math.rsqrt %22 : vector<16x1xf32>
    %24 = vector.broadcast %23 : vector<16x1xf32> to vector<16x32xf32>
    %25 = arith.mulf %20, %24 : vector<16x32xf32>
    %26 = vector.broadcast %5 : vector<1x32xf32> to vector<16x32xf32>
    %27 = arith.mulf %25, %26 : vector<16x32xf32>
    %28 = vector.broadcast %7 : vector<1x32xf32> to vector<16x32xf32>
    %29 = arith.addf %27, %28 : vector<16x32xf32>
    %c0_12 = arith.constant 0 : index
    %c0_13 = arith.constant 0 : index
    %c0_14 = arith.constant 0 : index
    %30 = vector.load %arg7[%c0_12, %c0_13, %c0_14] : memref<1x16x16xf32, #tpu.memory_space<vmem>>, vector<1x16x16xf32>
    %31 = vector.shape_cast %30 : vector<1x16x16xf32> to vector<16x16xf32>
    %cst_15 = arith.constant dense<0.000000e+00> : vector<16x32xf32>
    %32 = tpu.matmul %31, %29, %cst_15 {dimension_numbers = #tpu.dot_dimension_numbers<[1], [0], [0], [1], [0, 0, 1, 1], [], []>} : vector<16x16xf32>, vector<16x32xf32>, vector<16x32xf32> -> vector<16x32xf32>
    %c0_16 = arith.constant 0 : index
    %c0_17 = arith.constant 0 : index
    %c0_18 = arith.constant 0 : index
    %33 = vector.load %arg8[%c0_16, %c0_17, %c0_18] : memref<1x16x1xf32, #tpu.memory_space<vmem>>, vector<1x16x1xf32>
    %34 = vector.shape_cast %33 : vector<1x16x1xf32> to vector<16x1xf32>
    %35 = vector.broadcast %34 : vector<16x1xf32> to vector<16x32xf32>
    %36 = arith.addf %32, %35 : vector<16x32xf32>
    %cst_19 = arith.constant 5.000000e-01 : f32
    %37 = vector.broadcast %cst_19 : f32 to vector<16x32xf32>
    %38 = arith.mulf %37, %36 : vector<16x32xf32>
    %cst_20 = arith.constant 0.707106769 : f32
    %39 = vector.broadcast %cst_20 : f32 to vector<16x32xf32>
    %40 = arith.mulf %36, %39 : vector<16x32xf32>
    %41 = math.erf %40 : vector<16x32xf32>
    %cst_21 = arith.constant 1.000000e+00 : f32
    %42 = vector.broadcast %cst_21 : f32 to vector<16x32xf32>
    %43 = arith.addf %42, %41 : vector<16x32xf32>
    %44 = arith.mulf %38, %43 : vector<16x32xf32>
    %c0_22 = arith.constant 0 : index
    %c0_23 = arith.constant 0 : index
    %c0_24 = arith.constant 0 : index
    %45 = vector.load %arg9[%c0_22, %c0_23, %c0_24] : memref<1x16x16xf32, #tpu.memory_space<vmem>>, vector<1x16x16xf32>
    %46 = vector.shape_cast %45 : vector<1x16x16xf32> to vector<16x16xf32>
    %cst_25 = arith.constant dense<0.000000e+00> : vector<16x32xf32>
    %47 = tpu.matmul %46, %44, %cst_25 {dimension_numbers = #tpu.dot_dimension_numbers<[1], [0], [0], [1], [0, 0, 1, 1], [], []>} : vector<16x16xf32>, vector<16x32xf32>, vector<16x32xf32> -> vector<16x32xf32>
    %c0_26 = arith.constant 0 : index
    %c0_27 = arith.constant 0 : index
    %c0_28 = arith.constant 0 : index
    %48 = vector.load %arg10[%c0_26, %c0_27, %c0_28] : memref<1x16x1xf32, #tpu.memory_space<vmem>>, vector<1x16x1xf32>
    %49 = vector.shape_cast %48 : vector<1x16x1xf32> to vector<16x1xf32>
    %50 = vector.broadcast %49 : vector<16x1xf32> to vector<16x32xf32>
    %51 = arith.addf %47, %50 : vector<16x32xf32>
    %52 = arith.addf %3, %51 : vector<16x32xf32>
    %cst_29 = arith.constant dense<0.000000e+00> : vector<16xf32>
    %53 = vector.multi_reduction <add>, %52, %cst_29 [1] : vector<16x32xf32> to vector<16xf32>
    %54 = vector.shape_cast %53 : vector<16xf32> to vector<16x1xf32>
    %cst_30 = arith.constant 3.200000e+01 : f32
    %55 = vector.broadcast %cst_30 : f32 to vector<16x1xf32>
    %56 = arith.divf %54, %55 : vector<16x1xf32>
    %57 = vector.broadcast %56 : vector<16x1xf32> to vector<16x32xf32>
    %58 = arith.subf %52, %57 : vector<16x32xf32>
    %59 = arith.mulf %58, %58 : vector<16x32xf32>
    %cst_31 = arith.constant dense<0.000000e+00> : vector<16xf32>
    %60 = vector.multi_reduction <add>, %59, %cst_31 [1] : vector<16x32xf32> to vector<16xf32>
    %61 = vector.shape_cast %60 : vector<16xf32> to vector<16x1xf32>
    %cst_32 = arith.constant 3.200000e+01 : f32
    %62 = vector.broadcast %cst_32 : f32 to vector<16x1xf32>
    %63 = arith.divf %61, %62 : vector<16x1xf32>
    %64 = vector.broadcast %56 : vector<16x1xf32> to vector<16x32xf32>
    %65 = arith.subf %52, %64 : vector<16x32xf32>
    %cst_33 = arith.constant 9.99999974E-6 : f32
    %66 = vector.broadcast %cst_33 : f32 to vector<16x1xf32>
    %67 = arith.addf %63, %66 : vector<16x1xf32>
    %68 = math.rsqrt %67 : vector<16x1xf32>
    %69 = vector.broadcast %68 : vector<16x1xf32> to vector<16x32xf32>
    %70 = arith.mulf %65, %69 : vector<16x32xf32>
    %71 = vector.broadcast %5 : vector<1x32xf32> to vector<16x32xf32>
    %72 = arith.mulf %70, %71 : vector<16x32xf32>
    %73 = vector.broadcast %7 : vector<1x32xf32> to vector<16x32xf32>
    %74 = arith.addf %72, %73 : vector<16x32xf32>
    %c0_34 = arith.constant 0 : index
    %c0_35 = arith.constant 0 : index
    %c0_36 = arith.constant 0 : index
    %75 = vector.load %arg11[%c0_34, %c0_35, %c0_36] : memref<1x32x64xf32, #tpu.memory_space<vmem>>, vector<1x32x64xf32>
    %76 = vector.shape_cast %75 : vector<1x32x64xf32> to vector<32x64xf32>
    %cst_37 = arith.constant dense<0.000000e+00> : vector<16x64xf32>
    %77 = tpu.matmul %74, %76, %cst_37 {dimension_numbers = #tpu.dot_dimension_numbers<[1], [0], [0], [1], [0, 0, 1, 1], [], []>} : vector<16x32xf32>, vector<32x64xf32>, vector<16x64xf32> -> vector<16x64xf32>
    %c0_38 = arith.constant 0 : index
    %c0_39 = arith.constant 0 : index
    %c0_40 = arith.constant 0 : index
    %78 = vector.load %arg12[%c0_38, %c0_39, %c0_40] : memref<1x1x64xf32, #tpu.memory_space<vmem>>, vector<1x1x64xf32>
    %79 = vector.shape_cast %78 : vector<1x1x64xf32> to vector<1x64xf32>
    %80 = vector.broadcast %79 : vector<1x64xf32> to vector<16x64xf32>
    %81 = arith.addf %77, %80 : vector<16x64xf32>
    %cst_41 = arith.constant 5.000000e-01 : f32
    %82 = vector.broadcast %cst_41 : f32 to vector<16x64xf32>
    %83 = arith.mulf %82, %81 : vector<16x64xf32>
    %cst_42 = arith.constant 0.707106769 : f32
    %84 = vector.broadcast %cst_42 : f32 to vector<16x64xf32>
    %85 = arith.mulf %81, %84 : vector<16x64xf32>
    %86 = math.erf %85 : vector<16x64xf32>
    %cst_43 = arith.constant 1.000000e+00 : f32
    %87 = vector.broadcast %cst_43 : f32 to vector<16x64xf32>
    %88 = arith.addf %87, %86 : vector<16x64xf32>
    %89 = arith.mulf %83, %88 : vector<16x64xf32>
    %c0_44 = arith.constant 0 : index
    %c0_45 = arith.constant 0 : index
    %c0_46 = arith.constant 0 : index
    %90 = vector.load %arg13[%c0_44, %c0_45, %c0_46] : memref<1x64x32xf32, #tpu.memory_space<vmem>>, vector<1x64x32xf32>
    %91 = vector.shape_cast %90 : vector<1x64x32xf32> to vector<64x32xf32>
    %cst_47 = arith.constant dense<0.000000e+00> : vector<16x32xf32>
    %92 = tpu.matmul %89, %91, %cst_47 {dimension_numbers = #tpu.dot_dimension_numbers<[1], [0], [0], [1], [0, 0, 1, 1], [], []>} : vector<16x64xf32>, vector<64x32xf32>, vector<16x32xf32> -> vector<16x32xf32>
    %c0_48 = arith.constant 0 : index
    %c0_49 = arith.constant 0 : index
    %c0_50 = arith.constant 0 : index
    %93 = vector.load %arg14[%c0_48, %c0_49, %c0_50] : memref<1x1x32xf32, #tpu.memory_space<vmem>>, vector<1x1x32xf32>
    %94 = vector.shape_cast %93 : vector<1x1x32xf32> to vector<1x32xf32>
    %95 = vector.broadcast %94 : vector<1x32xf32> to vector<16x32xf32>
    %96 = arith.addf %92, %95 : vector<16x32xf32>
    %97 = arith.addf %52, %96 : vector<16x32xf32>
    %c1_i32 = arith.constant 1 : i32
    %98 = arith.cmpi slt, %arg1, %c1_i32 : i32
    %99 = arith.extui %98 : i1 to i32
    %c0_i32_51 = arith.constant 0 : i32
    %100 = arith.cmpi ne, %99, %c0_i32_51 : i32
    scf.if %100 {
      %c0_54 = arith.constant 0 : index
      %c0_55 = arith.constant 0 : index
      %104 = vector.load %arg20[%c0_54, %c0_55] : memref<16x32xf32, #tpu.memory_space<vmem>>, vector<16x32xf32>
      tpu.vector_store %arg20[%c0_54, %c0_55], %97 {strides = array<i32>} : memref<16x32xf32, #tpu.memory_space<vmem>>, vector<16x32xf32>,
    } else {
    }
    %c1_i32_52 = arith.constant 1 : i32
    %101 = arith.cmpi eq, %arg1, %c1_i32_52 : i32
    %102 = arith.extui %101 : i1 to i32
    %c0_i32_53 = arith.constant 0 : i32
    %103 = arith.cmpi ne, %102, %c0_i32_53 : i32
    scf.if %103 {
      %c0_54 = arith.constant 0 : index
      %c0_55 = arith.constant 0 : index
      %104 = vector.load %arg15[%c0_54, %c0_55] : memref<1x32xf32, #tpu.memory_space<vmem>>, vector<1x32xf32>
      %c0_56 = arith.constant 0 : index
      %c0_57 = arith.constant 0 : index
      %105 = vector.load %arg16[%c0_56, %c0_57] : memref<1x32xf32, #tpu.memory_space<vmem>>, vector<1x32xf32>
      %cst_58 = arith.constant dense<0.000000e+00> : vector<16xf32>
      %106 = vector.multi_reduction <add>, %97, %cst_58 [1] : vector<16x32xf32> to vector<16xf32>
      %107 = vector.shape_cast %106 : vector<16xf32> to vector<16x1xf32>
      %cst_59 = arith.constant 3.200000e+01 : f32
      %108 = vector.broadcast %cst_59 : f32 to vector<16x1xf32>
      %109 = arith.divf %107, %108 : vector<16x1xf32>
      %110 = vector.broadcast %109 : vector<16x1xf32> to vector<16x32xf32>
      %111 = arith.subf %97, %110 : vector<16x32xf32>
      %112 = arith.mulf %111, %111 : vector<16x32xf32>
      %cst_60 = arith.constant dense<0.000000e+00> : vector<16xf32>
      %113 = vector.multi_reduction <add>, %112, %cst_60 [1] : vector<16x32xf32> to vector<16xf32>
      %114 = vector.shape_cast %113 : vector<16xf32> to vector<16x1xf32>
      %cst_61 = arith.constant 3.200000e+01 : f32
      %115 = vector.broadcast %cst_61 : f32 to vector<16x1xf32>
      %116 = arith.divf %114, %115 : vector<16x1xf32>
      %117 = vector.broadcast %109 : vector<16x1xf32> to vector<16x32xf32>
      %118 = arith.subf %97, %117 : vector<16x32xf32>
      %cst_62 = arith.constant 9.99999974E-6 : f32
      %119 = vector.broadcast %cst_62 : f32 to vector<16x1xf32>
      %120 = arith.addf %116, %119 : vector<16x1xf32>
      %121 = math.rsqrt %120 : vector<16x1xf32>
      %122 = vector.broadcast %121 : vector<16x1xf32> to vector<16x32xf32>
      %123 = arith.mulf %118, %122 : vector<16x32xf32>
      %124 = vector.broadcast %104 : vector<1x32xf32> to vector<16x32xf32>
      %125 = arith.mulf %123, %124 : vector<16x32xf32>
      %126 = vector.broadcast %105 : vector<1x32xf32> to vector<16x32xf32>
      %127 = arith.addf %125, %126 : vector<16x32xf32>
      %c0_63 = arith.constant 0 : index
      %c0_64 = arith.constant 0 : index
      %128 = vector.load %arg17[%c0_63, %c0_64] : memref<32x128xf32, #tpu.memory_space<vmem>>, vector<32x128xf32>
      %cst_65 = arith.constant dense<0.000000e+00> : vector<16x128xf32>
      %129 = tpu.matmul %127, %128, %cst_65 {dimension_numbers = #tpu.dot_dimension_numbers<[1], [0], [0], [1], [0, 0, 1, 1], [], []>} : vector<16x32xf32>, vector<32x128xf32>, vector<16x128xf32> -> vector<16x128xf32>
      %c0_66 = arith.constant 0 : index
      %c0_67 = arith.constant 0 : index
      %130 = vector.load %arg18[%c0_66, %c0_67] : memref<1x128xf32, #tpu.memory_space<vmem>>, vector<1x128xf32>
      %131 = vector.broadcast %130 : vector<1x128xf32> to vector<16x128xf32>
      %132 = arith.addf %129, %131 : vector<16x128xf32>
      %c0_68 = arith.constant 0 : index
      %c0_69 = arith.constant 0 : index
      %c0_70 = arith.constant 0 : index
      %133 = vector.load %arg19[%c0_68, %c0_69, %c0_70] : memref<1x16x128xf32, #tpu.memory_space<vmem>>, vector<1x16x128xf32>
      %134 = vector.shape_cast %133 : vector<1x16x128xf32> to vector<16x128xf32>
      %135 = vector.shape_cast %132 : vector<16x128xf32> to vector<1x16x128xf32>
      tpu.vector_store %arg19[%c0_68, %c0_69, %c0_70], %135 {strides = array<i32>} : memref<1x16x128xf32, #tpu.memory_space<vmem>>, vector<1x16x128xf32>,
    } else {
    }
    return
  }
  func.func @transform_0(%arg0: i32, %arg1: i32) -> (i32, i32, i32) {
    %c0_i32 = arith.constant 0 : i32
    %c0_i32_0 = arith.constant 0 : i32
    %c0_i32_1 = arith.constant 0 : i32
    return %arg0, %c0_i32, %c0_i32_0 : i32, i32, i32
  }
  func.func @transform_1(%arg0: i32, %arg1: i32) -> (i32, i32) {
    %c0_i32 = arith.constant 0 : i32
    %c0_i32_0 = arith.constant 0 : i32
    %c0_i32_1 = arith.constant 0 : i32
    return %c0_i32, %c0_i32_0 : i32, i32
  }
  func.func @transform_2(%arg0: i32, %arg1: i32) -> (i32, i32, i32) {
    %c0_i32 = arith.constant 0 : i32
    %c0_i32_0 = arith.constant 0 : i32
    %c0_i32_1 = arith.constant 0 : i32
    %c0_i32_2 = arith.constant 0 : i32
    return %c0_i32, %c0_i32_0, %c0_i32_1 : i32, i32, i32
  }
  func.func @transform_3(%arg0: i32, %arg1: i32) -> (i32, i32, i32) {
    %c0_i32 = arith.constant 0 : i32
    %c0_i32_0 = arith.constant 0 : i32
    %c0_i32_1 = arith.constant 0 : i32
    return %arg1, %c0_i32, %c0_i32_0 : i32, i32, i32
  }
  func.func @transform_4(%arg0: i32, %arg1: i32) -> (i32, i32, i32) {
    %c0_i32 = arith.constant 0 : i32
    %c0_i32_0 = arith.constant 0 : i32
    %c0_i32_1 = arith.constant 0 : i32
    return %arg1, %c0_i32, %c0_i32_0 : i32, i32, i32
  }
  func.func @transform_5(%arg0: i32, %arg1: i32) -> (i32, i32, i32) {
    %c0_i32 = arith.constant 0 : i32
    %c0_i32_0 = arith.constant 0 : i32
    %c0_i32_1 = arith.constant 0 : i32
    return %arg1, %c0_i32, %c0_i32_0 : i32, i32, i32
  }
  func.func @transform_6(%arg0: i32, %arg1: i32) -> (i32, i32, i32) {
    %c0_i32 = arith.constant 0 : i32
    %c0_i32_0 = arith.constant 0 : i32
    %c0_i32_1 = arith.constant 0 : i32
    return %arg1, %c0_i32, %c0_i32_0 : i32, i32, i32
  }
  func.func @transform_7(%arg0: i32, %arg1: i32) -> (i32, i32, i32) {
    %c0_i32 = arith.constant 0 : i32
    %c0_i32_0 = arith.constant 0 : i32
    %c0_i32_1 = arith.constant 0 : i32
    return %arg1, %c0_i32, %c0_i32_0 : i32, i32, i32
  }
  func.func @transform_8(%arg0: i32, %arg1: i32) -> (i32, i32, i32) {
    %c0_i32 = arith.constant 0 : i32
    %c0_i32_0 = arith.constant 0 : i32
    %c0_i32_1 = arith.constant 0 : i32
    return %arg1, %c0_i32, %c0_i32_0 : i32, i32, i32
  }
  func.func @transform_9(%arg0: i32, %arg1: i32) -> (i32, i32, i32) {
    %c0_i32 = arith.constant 0 : i32
    %c0_i32_0 = arith.constant 0 : i32
    %c0_i32_1 = arith.constant 0 : i32
    return %arg1, %c0_i32, %c0_i32_0 : i32, i32, i32
  }
  func.func @transform_10(%arg0: i32, %arg1: i32) -> (i32, i32, i32) {
    %c0_i32 = arith.constant 0 : i32
    %c0_i32_0 = arith.constant 0 : i32
    %c0_i32_1 = arith.constant 0 : i32
    return %arg1, %c0_i32, %c0_i32_0 : i32, i32, i32
  }
  func.func @transform_11(%arg0: i32, %arg1: i32) -> (i32, i32, i32) {
    %c0_i32 = arith.constant 0 : i32
    %c0_i32_0 = arith.constant 0 : i32
    %c0_i32_1 = arith.constant 0 : i32
    return %arg1, %c0_i32, %c0_i32_0 : i32, i32, i32
  }
  func.func @transform_12(%arg0: i32, %arg1: i32) -> (i32, i32, i32) {
    %c0_i32 = arith.constant 0 : i32
    %c0_i32_0 = arith.constant 0 : i32
    %c0_i32_1 = arith.constant 0 : i32
    return %arg1, %c0_i32, %c0_i32_0 : i32, i32, i32
  }
  func.func @transform_13(%arg0: i32, %arg1: i32) -> (i32, i32) {
    %c0_i32 = arith.constant 0 : i32
    %c0_i32_0 = arith.constant 0 : i32
    %c0_i32_1 = arith.constant 0 : i32
    return %c0_i32, %c0_i32_0 : i32, i32
  }
  func.func @transform_14(%arg0: i32, %arg1: i32) -> (i32, i32) {
    %c0_i32 = arith.constant 0 : i32
    %c0_i32_0 = arith.constant 0 : i32
    %c0_i32_1 = arith.constant 0 : i32
    return %c0_i32, %c0_i32_0 : i32, i32
  }
  func.func @transform_15(%arg0: i32, %arg1: i32) -> (i32, i32) {
    %c0_i32 = arith.constant 0 : i32
    %c0_i32_0 = arith.constant 0 : i32
    %c0_i32_1 = arith.constant 0 : i32
    return %c0_i32, %c0_i32_0 : i32, i32
  }
  func.func @transform_16(%arg0: i32, %arg1: i32) -> (i32, i32) {
    %c0_i32 = arith.constant 0 : i32
    %c0_i32_0 = arith.constant 0 : i32
    %c0_i32_1 = arith.constant 0 : i32
    return %c0_i32, %c0_i32_0 : i32, i32
  }
  func.func @transform_17(%arg0: i32, %arg1: i32) -> (i32, i32, i32) {
    %c0_i32 = arith.constant 0 : i32
    %c0_i32_0 = arith.constant 0 : i32
    %c0_i32_1 = arith.constant 0 : i32
    return %arg0, %c0_i32, %c0_i32_0 : i32, i32, i32
  }
}

</mosaic_0001>

<bundles_post_ra>
// kernel: tpu_custom_call.1
= control target key start
LH: loop header
LB: loop body
LE: loop exit
PB: predicated region body
PF: predicated region fallthrough
CT: control target
= control target key end

     0   :  { %s2523_s0 = inlined_call_operand.vmem [shape: f32[2,16,64], index: 0, kind: input, shape index: {}]   ;;  %s2524_s1 = inlined_call_operand.vmem [shape: f32[64,32], index: 1, kind: input, shape index: {}]   ;;  %s2525_s2 = inlined_call_operand.vmem [shape: f32[1,16,32], index: 2, kind: input, shape index: {}]   ;;  %s2526_s3 = inlined_call_operand.vmem [shape: f32[2,1,32], index: 3, kind: input, shape index: {}]   ;;  %s2527_s4 = inlined_call_operand.vmem [shape: f32[2,1,32], index: 4, kind: input, shape index: {}]   ;;  %s2528_s5 = inlined_call_operand.vmem [shape: f32[2,16,16], index: 5, kind: input, shape index: {}]   ;;  %s2529_s6 = inlined_call_operand.vmem [shape: f32[2,16,1], index: 6, kind: input, shape index: {}]   ;;  %s2530_s7 = inlined_call_operand.vmem [shape: f32[2,16,16], index: 7, kind: input, shape index: {}]   ;;  %s2531_s8 = inlined_call_operand.vmem [shape: f32[2,16,1], index: 8, kind: input, shape index: {}]   ;;  %s2532_s9 = inlined_call_operand.vmem [shape: f32[2,32,64], index: 9, kind: input, shape index: {}]   ;;  %s2533_s10 = inlined_call_operand.vmem [shape: f32[2,1,64], index: 10, kind: input, shape index: {}]   ;;  %s2534_s11 = inlined_call_operand.vmem [shape: f32[2,64,32], index: 11, kind: input, shape index: {}]   ;;  %s2535_s12 = inlined_call_operand.vmem [shape: f32[2,1,32], index: 12, kind: input, shape index: {}]   ;;  %s2536_s13 = inlined_call_operand.vmem [shape: f32[1,32], index: 13, kind: input, shape index: {}]   ;;  %s2537_s14 = inlined_call_operand.vmem [shape: f32[1,32], index: 14, kind: input, shape index: {}]   ;;  %s2538_s15 = inlined_call_operand.vmem [shape: f32[32,128], index: 15, kind: input, shape index: {}]   ;;  %s2539_s16 = inlined_call_operand.vmem [shape: f32[1,128], index: 16, kind: input, shape index: {}]   ;;  %s2540_s17 = inlined_call_operand.hbm [shape: f32[2,16,128], index: 17, kind: output, shape index: {}]  }
   0x1   :  { %2557 = sst [smem:[#allocation18_spill]] %s2523_s0 }
   0x2   :  { %2558 = sst [smem:[#allocation19_spill]] %s2524_s1 }
   0x3   :  { %2559 = sst [smem:[#allocation20_spill]] %s2528_s5 }
   0x4   :  { %2560 = sst [smem:[#allocation21_spill]] %s2529_s6 }
   0x5   :  { %2561 = sst [smem:[#allocation22_spill]] %s2530_s7 }
   0x6   :  { %2562 = sst [smem:[#allocation23_spill]] %s2536_s13 }
   0x7   :  { %2563 = sst [smem:[#allocation24_spill]] %s2537_s14 }
   0x8   :  { %2564 = sst [smem:[#allocation25_spill]] %s2538_s15 }
   0x9   :  { %2565 = sst [smem:[#allocation26_spill]] %s2539_s16 }
   0xa   :  { %2566 = sst [smem:[#allocation27_spill]] %s2540_s17 }
   0xb   :  { %22 = vsyncpa [#allocation4], 0 }
   0xc   :  { %24 = vsyncpa [#allocation4 + $0x1], 0  ;;  %s2172_s24 = smov 0   ;;  %s2174_s25 = smov 0  }
   0xd   :  { %s2176_s26 = smov 0   ;;  %s2178_s27 = smov 0  }
   0xe   :  { %s2180_s28 = smov 0   ;;  %s2182_s29 = smov 0  }
   0xf   :  { %s2184_s0 = smov 0   ;;  %s2186_s30 = smov 0  }
  0x10 LB: > { %2567 = sst [smem:[#allocation6_spill]] %s2048_s24  ;;  %s1661_s18 = sadd.s32 4294967295, %s2076_s30   ;;  %s2076_s30 = sphi %s2186_s30, %s30_s30   ;;  %s2072_s0 = sphi %s2184_s0, %s2606_s0   ;;  %s2068_s29 = sphi %s2182_s29, %s2605_s29   ;;  %s2064_s28 = sphi %s2180_s28, %s2604_s28   ;;  %s2060_s27 = sphi %s2178_s27, %s2603_s27   ;;  %s2056_s26 = sphi %s2176_s26, %s2602_s26   ;;  %s2052_s25 = sphi %s2174_s25, %s2601_s25   ;;  %s2048_s24 = sphi %s2172_s24, %s2600_s24  }
  0x11   : > { %2568 = sst [smem:[#allocation7_spill]] %s2052_s25  ;;  %s1662_s19 = sadd.s32 4294967294, %s2076_s30  }
  0x12   : > { %2569 = sst [smem:[#allocation8_spill]] %s2056_s26  ;;  %s39_s1 = sadd.s32 1, %s2068_s29 }
  0x13   : > { %2570 = sst [smem:[#allocation9_spill]] %s2064_s28  ;;  %p40_p0 = scmp.ge.s32.totalorder %s39_s1, 2 }
  0x14   : > { %2571 = sst [smem:[#allocation10_spill]] %s2068_s29  ;;  %s42_s20 = sadd.s32 1, %s2072_s0 }
  0x15   : > { %2572 = sst [smem:[#allocation11_spill]] %s2072_s0  ;;  %p471_p1 = scmp.ne.s32.totalorder %s2056_s26, %s2052_s25 }
  0x16   : > { %2573 = sst [smem:[#allocation12_spill]] %s2076_s30  ;;  %p472_p2 = scmp.eq.s32.totalorder %s1661_s18, 3 }
  0x17   : > { %s2608_s1 = smov (%p40_p0, %s39_s1), 0  ;;  %s2610_s20 = smov (!%p40_p0, %s42_s20), %s2072_s0 }
  0x18   : > { %2574 = sst [smem:[#allocation13_spill]] %s2608_s1  ;;  %p2221_p3 = por %p472_p2, %p471_p1 }
  0x19   : > { %p477_p4 = scmp.ne.s32.totalorder %s2052_s25, %s2048_s24  ;;  %p44_p5 = scmp.ge.s32.totalorder %s2610_s20, 2 }
  0x1a   : > { %s2575_s21 = scalar_select %p2221_p3, 1, 0 }
  0x1b   : > { %p478_p6 = scmp.eq.s32.totalorder %s1662_s19, 3  ;;  %p1665_p7 = scmp.ge.s32.totalorder %s2076_s30, 1 }
  0x1c   : > { %2576 = sst [smem:[#allocation14_spill]] %s2575_s21  ;;  %p594_p8 = scmp.lt.s32.totalorder %s2076_s30, 5 }
  0x1d   : > { %s2612_s20 = smov (%p44_p5, %s2610_s20), 0  ;;  %p2231_p9 = por %p478_p6, %p477_p4 }
  0x1e   : > { %2577 = sst [smem:[#allocation15_spill]] %s2612_s20  ;;  %p595_p10 = pnand %p1665_p7, %p594_p8 }
  0x1f   : > { %s2578_s22 = scalar_select %p2231_p9, 1, 0 }
  0x20   : > { %s458_s23 = ssub.s32 %s2072_s0, %s2612_s20  ;;  %s461_s18 = sadd.s32 1, %s2056_s26 }
  0x21   : > { %2579 = sst [smem:[#allocation16_spill]] %s2578_s22  ;;  %p459_p11 = scmp.eq.s32.totalorder %s458_s23, 0 }
  0x22   : > { %598 = sbr.rel (%p595_p10) target bundleno = 2405 (0x965), region = 88  ;;  %s2550_s19 = sand.u32 (!%p595_p10), 1, %s2052_s25  }
  0x23   : > { %s2239_s1 = scalar_select %p459_p11, %s2056_s26, %s461_s18  }
  0x24   : > { %p688_p12 = scmp.lt.s32.totalorder (!%p595_p10), %s2064_s28, 1  ;;  %s1666_s29 = sshll.u32 (!%p595_p10), %s2550_s19, 4 }
  0x25   : > { %2580 = sst [smem:[#allocation17_spill]] %s2239_s1  ;;  %p693_p13 = scmp.lt.s32.totalorder (!%p595_p10), %s2060_s27, 1 }
  0x26   : > { %s2581_s0 = sld [smem:[#allocation18_spill]] (!%p595_p10)  ;;  %s2582_s5 = sld [smem:[#allocation20_spill]] (!%p595_p10) }
  0x27   : > { %s2583_s6 = sld [smem:[#allocation21_spill]] (!%p595_p10)  ;;  %s2584_s7 = sld [smem:[#allocation22_spill]] (!%p595_p10) }
  0x28   : > { %s2304_s18 = scalar_lea.vmem (!%p595_p10), [#allocation3], %s1666_s29  ;;  %p1681_p0 = scmp.ne.s32.totalorder (!%p595_p10), %s2060_s27, 0 }
  0x29   : > { %s689_s24 = scalar_select %p688_p12, %s2064_s28, 1 }
  0x2a   : > { %s2248_s22 = scalar_select %p693_p13, %s2060_s27, 1 }
  0x2b   : > { %s1708_s23 = sshll.u32 %s689_s24, 4  ;;  %738 = sbr.rel (%p1681_p0) target bundleno = 291 (0x123), region = 92  ;;  %vm751_vm0 = vcmask (!%p1681_p0), 523264   ;;  %v750_v14 = vld [vmem:[%s2525_s2 + $0x8] sm:$0xff] (!%p1681_p0)  ;;  %v749_v15 = vld [vmem:[%s2525_s2] sm:$0xff] (!%p1681_p0)  ;;  %vm833_vm1 = vcmask (!%p1681_p0), 261120  }
  0x2c   : > { %s2253_s1 = scalar_lea.vmem %s2581_s0, %s1708_s23  ;;  %s1709_s28 = sshll.u32 %s2248_s22, 4 }
  0x2d   : > { %s2267_s13 = scalar_lea.vmem %s2582_s5, %s1709_s28  ;;  %s2272_s20 = scalar_lea.vmem %s2583_s6, %s1709_s28  ;;  %v739_v8 = vld [vmem:[%s2253_s1] sm:$0xff] (!%p1681_p0)  ;;  %v740_v13 = vld [vmem:[%s2253_s1 + $0x8] sm:$0xff] (!%p1681_p0) }
  0x2e   : > { %s2277_s26 = scalar_lea.vmem %s2584_s7, %s1709_s28  ;;  %s2282_s17 = scalar_lea.vmem %s2531_s8, %s1709_s28  ;;  %1772 = vmatprep.mubr.msk.f32.mxu0 (!%p1681_p0), %vm751_vm0, %v739_v8 }
  0x2f   : > { %s1713_s21 = sshll.u32 %s2248_s22, 5  ;;  %s726_s16 = scalar_lea.vmem %s2533_s10, %s2248_s22 }
  0x30   : > { %s2292_s15 = scalar_lea.vmem %s2532_s9, %s1713_s21  ;;  %s1714_s24 = sshll.u32 %s2248_s22, 6 }
  0x31   : > { %s2298_s23 = scalar_lea.vmem %s2534_s11, %s1714_s24  ;;  %s734_s28 = scalar_lea.vmem %s2535_s12, %s2248_s22 }
  0x32   : > { %s2585_s5 = sld [smem:[#allocation19_spill]] }
  0x38   : > { %v741_v0 = vld [vmem:[%s2585_s5] sm:$0xff]  ;;  %v742_v1 = vld [vmem:[%s2585_s5 + $0x8] sm:$0xff]  ;;  %v743_v2 = vld [vmem:[%s2585_s5 + $0x10] sm:$0xff] }
  0x39   : > { %v1830_v3 = vpack.c.bf16 %v742_v1, %v741_v0  ;;  %v744_v4 = vld [vmem:[%s2585_s5 + $0x18] sm:$0xff]  ;;  %v745_v6 = vld [vmem:[%s2585_s5 + $0x20] sm:$0xff]  ;;  %v746_v7 = vld [vmem:[%s2585_s5 + $0x28] sm:$0xff] }
  0x3a   : > { %v1834_v5 = vpack.c.bf16 %v744_v4, %v743_v2  ;;  %v1838_v9 = vpack.c.bf16 %v746_v7, %v745_v6  ;;  %v747_v10 = vld [vmem:[%s2585_s5 + $0x30] sm:$0xff]  ;;  %v748_v11 = vld [vmem:[%s2585_s5 + $0x38] sm:$0xff] }
  0x3b   : > { %1831 = vmatprep.subr.bf16.mxu0 %v1830_v3  ;;  %v1842_v12 = vpack.c.bf16 %v748_v11, %v747_v10 }
  0x3c   : > { %1833 = vmatpush3.bf16.msra.mxu0 %v1830_v3 }
  0x3d   : > { %1835 = vmatprep.subr.bf16.mxu0 %v1834_v5 }
  0x40   : > { %1837 = vmatpush3.bf16.msra.mxu0 %v1834_v5 }
  0x41   : > { %1839 = vmatprep.subr.bf16.mxu0 %v1838_v9 }
  0x44   : > { %1841 = vmatpush3.bf16.msra.mxu0 %v1838_v9 }
  0x45   : > { %1843 = vmatprep.subr.bf16.mxu0 %v1842_v12 }
  0x48   : > { %1845 = vmatpush3.bf16.msra.mxu0 %v1842_v12 }
  0x4b   : > { %1773 = vmatmul.mubr.msk.f32.vlgmr.msra.gmra.mrb[0].mxu0 %vm751_vm0, %v740_v13 }
 0x11e   : > { %v1774_v16 = vpop.f32.mrb[0].mxu0 }
 0x11f   : > { %v830_v17 = vadd.f32 %v1774_v16, %v750_v14  ;;  %v824_v18 = vpop.f32.mrb[1].mxu0 }
 0x120   : > { %v825_v19 = vadd.f32 %v824_v18, %v749_v15 }
 0x121   : > { %835 = vst.msk [vmem:[#allocation2 + $0x8] sm:$0xff] %vm833_vm1, %v830_v17 }
 0x122   : > { %834 = vst.msk [vmem:[#allocation2] sm:$0xff] %vm833_vm1, %v825_v19 }
 0x123 PF: > { %vm840_vm2 = vcmask 261120   ;;  %v884_v34 = vld [vmem:[%s2267_s13] sm:$0xff]  ;;  %vm898_vm3 = vcmask 130048   ;;  %v887_v35 = vld [vmem:[%s2272_s20 + $0x8] sm:$0xff]  ;;  %v2078_v37 = vmov 0   ;;  %s2586_s25 = scalar_lea.vmem %s2526_s3, %s2248_s22  ;;  %s2587_s19 = scalar_lea.vmem %s2527_s4, %s2248_s22  ;;  %vm1234_vm4 = vcmask 523264  }
 0x124   : > { %1779 = vmatprep.mubr.msk.f32.mxu0 %vm898_vm3, %v884_v34  ;;  %v886_v36 = vld [vmem:[%s2272_s20] sm:$0xff]  ;;  %1961 = vset.pattern.permute.xlu1 %v2078_v37  ;;  %v993_v39 = vld [vmem:[%s2282_s17 + $0x8] sm:$0xff]  ;;  %p1696_p1 = scmp.ge.s32.totalorder %s2060_s27, 1 }
 0x125   : > { %1960 = vset.pattern.permute.xlu0 %v2078_v37  ;;  %v992_v38 = vld [vmem:[%s2282_s17] sm:$0xff]  ;;  %v885_v57 = vld [vmem:[%s2267_s13 + $0x8] sm:$0xff]  ;;  %v1120_v37 = vld [vmem:[%s2292_s15 + $0x18] sm:$0xff] }
 0x126   : > { %v2364_v48 = vld [vmem:[%s2586_s25] ss:$0 sm:$0xff]  ;;  %v991_v12 = vld [vmem:[%s2277_s26 + $0x8] sm:$0xff] }
 0x127   : > { %v2372_v52 = vld [vmem:[%s2587_s19] ss:$0 sm:$0xff]  ;;  %v1118_v34 = vld [vmem:[%s2292_s15 + $0x8] sm:$0xff] }
 0x128   : > { %v2343_v21 = vld [vmem:[#allocation2 + $0x8] sm:$0xff]  ;;  %v990_v58 = vld [vmem:[%s2277_s26] sm:$0xff] }
 0x129   : > { %v2341_v20 = vld [vmem:[#allocation2] sm:$0xff]  ;;  %v844_v23 = vsel %vm840_vm2, %v2343_v21, 0.0 }
 0x12a   : > { %v841_v22 = vsel %vm840_vm2, %v2341_v20, 0.0 }
 0x12b   : > { %842 = vadd.xlane.f32.xlu0 %v841_v22 }
 0x12f   : > { %845 = vadd.xlane.f32.xlu0 %v844_v23 }
 0x145   : > { %890 = vperm.xlu0 %1960, %v886_v36   ;;  %v1119_v36 = vld [vmem:[%s2292_s15 + $0x10] sm:$0xff] }
 0x1b8   : > { %v843_v24 = vpop.xlane.xlu0 %842 }
 0x1b9   : > { %v848_v25 = vmul.f32 0.03125, %v843_v24 }
 0x1bb   : > { %v850_v26 = vsub.f32 %v2341_v20, %v848_v25 }
 0x1bc   : > { %v846_v27 = vpop.xlane.xlu0 %845 }
 0x1bd   : > { %v849_v28 = vmul.f32 0.03125, %v846_v27  ;;  %v852_v29 = vmul.f32 %v850_v26, %v850_v26 }
 0x1bf   : > { %v851_v30 = vsub.f32 %v2343_v21, %v849_v28  ;;  %v854_v31 = vsel %vm840_vm2, %v852_v29, 0.0 }
 0x1c0   : > { %855 = vadd.xlane.f32.xlu1 %v854_v31 }
 0x1c1   : > { %v853_v32 = vmul.f32 %v851_v30, %v851_v30 }
 0x1c3   : > { %v857_v33 = vsel %vm840_vm2, %v853_v32, 0.0 }
 0x1c4   : > { %858 = vadd.xlane.f32.xlu1 %v857_v33  ;;  %v891_v59 = vpop.permute.xlu0 %890  ;;  %v1117_v33 = vld [vmem:[%s2292_s15] sm:$0xff] }
 0x1d5   : > { %895 = vperm.xlu1 %1961, %v887_v35   ;;  %v1854_v35 = vpack.c.bf16 %v1118_v34, %v1117_v33 }
 0x1d9   : > { %996 = vperm.xlu1 %1961, %v992_v38   ;;  %v1858_v38 = vpack.c.bf16 %v1120_v37, %v1119_v36 }
 0x1dd   : > { %1001 = vperm.xlu1 %1961, %v993_v39  }
 0x24d   : > { %v856_v40 = vpop.xlane.xlu1 %855 }
 0x24e   : > { %v860_v41 = vmul.f32 0.03125, %v856_v40 }
 0x250   : > { %v862_v42 = vadd.f32 1e-05, %v860_v41 }
 0x251   : > { %v859_v43 = vpop.xlane.xlu1 %858 }
 0x252   : > { %1962 = vrsqrt.f32 %v862_v42  ;;  %v861_v44 = vmul.f32 0.03125, %v859_v43 }
 0x254   : > { %v863_v45 = vadd.f32 1e-05, %v861_v44 }
 0x255   : > { %v896_v60 = vpop.permute.xlu1 %895 }
 0x256   : > { %1964 = vrsqrt.f32 %v863_v45 }
 0x259   : > { %v997_v13 = vpop.permute.xlu1 %996 }
 0x25c   : > { %v1963_v46 = vpop.eup %1962 }
 0x25d   : > { %v866_v47 = vmul.f32 %v1963_v46, %v850_v26  ;;  %v1002_v14 = vpop.permute.xlu1 %1001 }
 0x25f   : > { %v874_v51 = vmul.f32 %v2364_v48, %v866_v47 }
 0x260   : > { %v1965_v49 = vpop.eup %1964 }
 0x261   : > { %v867_v50 = vmul.f32 %v1965_v49, %v851_v30  ;;  %v882_v54 = vadd.f32 %v2372_v52, %v874_v51 }
 0x263   : > { %v875_v53 = vmul.f32 %v2364_v48, %v867_v50 }
 0x265   : > { %v883_v55 = vadd.f32 %v2372_v52, %v875_v53 }
 0x267   : > { %v1846_v56 = vpack.c.bf16 %v883_v55, %v882_v54  ;;  %v1219_v55 = vld [vmem:[%s2298_s23] sm:$0xff] }
 0x269   : > { %1847 = vmatprep.subr.bf16.mxu0 %v1846_v56 }
 0x26a   : > { %1849 = vmatpush3.bf16.msra.mxu0 %v1846_v56  ;;  %v1220_v56 = vld [vmem:[%s2298_s23 + $0x8] sm:$0xff] }
 0x26d   : > { %1780 = vmatmul.mubr.msk.f32.vlgmr.msra.gmra.mrb[0].mxu0 %vm898_vm3, %v885_v57  ;;  %v1862_v57 = vpack.c.bf16 %v1220_v56, %v1219_v55 }
 0x26e   : > { %1786 = vmatprep.mubr.msk.f32.mxu0 %vm898_vm3, %v990_v58  ;;  %v1221_v58 = vld [vmem:[%s2298_s23 + $0x10] sm:$0xff] }
 0x26f   : > { %1863 = vmatprep.subr.bf16.mxu1 %v1862_v57 }
 0x270   : > { %1865 = vmatpush3.bf16.msra.mxu1 %v1862_v57 }
 0x340   : > { %v1781_v61 = vpop.f32.mrb[0].mxu0 }
 0x341   : > { %v977_v62 = vadd.f32 %v1781_v61, %v896_v60  ;;  %v971_v63 = vpop.f32.mrb[1].mxu0  ;;  %v1224_v61 = vld [vmem:[%s2298_s23 + $0x28] sm:$0xff] }
 0x342   : > { %v972_v0 = vadd.f32 %v971_v63, %v891_v59  ;;  %v1222_v59 = vld [vmem:[%s2298_s23 + $0x18] sm:$0xff] }
 0x343   : > { %v983_v1 = vmul.f32 0.70710677, %v977_v62  ;;  %v981_v5 = vmul.f32 0.5, %v977_v62  ;;  %v1866_v60 = vpack.c.bf16 %v1222_v59, %v1221_v58  ;;  %v1226_v63 = vld [vmem:[%s2298_s23 + $0x38] sm:$0xff] }
 0x344   : > { %v982_v2 = vmul.f32 0.70710677, %v972_v0  ;;  %v980_v7 = vmul.f32 0.5, %v972_v0 }
 0x345   : > { %1966 = verf.f32 %v983_v1  ;;  %1867 = vmatprep.subr.bf16.mxu1 %v1866_v60  ;;  %v1690_v1 = vld [vmem:[%s726_s16] ss:$0 sm:$0xff] }
 0x346   : > { %1968 = verf.f32 %v982_v2  ;;  %1869 = vmatpush3.bf16.msra.mxu1 %v1866_v60 }
 0x34f   : > { %v1967_v3 = vpop.eup %1966 }
 0x350   : > { %v1969_v4 = vpop.eup %1968  ;;  %v987_v6 = vadd.f32 1.0, %v1967_v3 }
 0x351   : > { %v986_v8 = vadd.f32 1.0, %v1969_v4 }
 0x352   : > { %v989_v9 = vmul.f32 %v987_v6, %v981_v5 }
 0x353   : > { %v988_v10 = vmul.f32 %v986_v8, %v980_v7 }
 0x355   : > { %v1850_v11 = vpack.c.bf16 %v989_v9, %v988_v10 }
 0x357   : > { %1851 = vmatprep.subr.bf16.mxu0 %v1850_v11 }
 0x358   : > { %1853 = vmatpush3.bf16.msra.mxu0 %v1850_v11 }
 0x359   : > { %1855 = vmatprep.subr.bf16.mxu0 %v1854_v35 }
 0x35b   : > { %1787 = vmatmul.mubr.msk.f32.vlgmr.msra.gmra.mrb[2].mxu0 %vm898_vm3, %v991_v12 }
 0x35c   : > { %1857 = vmatpush3.bf16.msra.mxu0 %v1854_v35 }
 0x35d   : > { %1859 = vmatprep.subr.bf16.mxu0 %v1858_v38 }
 0x360   : > { %1861 = vmatpush3.bf16.msra.mxu0 %v1858_v38 }
 0x42e   : > { %v1788_v15 = vpop.f32.mrb[2].mxu0 }
 0x42f   : > { %v1082_v16 = vadd.f32 %v1788_v15, %v1002_v14  ;;  %v1076_v17 = vpop.f32.mrb[3].mxu0 }
 0x430   : > { %v1077_v18 = vadd.f32 %v1076_v17, %v997_v13 }
 0x431   : > { %v2384_v19 = vadd.f32 %v1082_v16, %v2343_v21  ;;  %v1693_v16 = vld [vmem:[%s734_s28] ss:$0 sm:$0xff] }
 0x432   : > { %v2387_v22 = vadd.f32 %v1077_v18, %v2341_v20 }
 0x433   : > { %v1090_v23 = vsel %vm840_vm2, %v2384_v19, 0.0 }
 0x434   : > { %1091 = vadd.xlane.f32.xlu0 %v1090_v23  ;;  %v1087_v24 = vsel %vm840_vm2, %v2387_v22, 0.0 }
 0x435   : > { %1088 = vadd.xlane.f32.xlu1 %v1087_v24 }
 0x4c1   : > { %v1092_v25 = vpop.xlane.xlu0 %1091 }
 0x4c2   : > { %v1094_v26 = vmul.f32 0.03125, %v1092_v25  ;;  %v1089_v27 = vpop.xlane.xlu1 %1088 }
 0x4c3   : > { %v1093_v21 = vmul.f32 0.03125, %v1089_v27 }
 0x4c4   : > { %v1096_v28 = vsub.f32 %v2384_v19, %v1094_v26 }
 0x4c5   : > { %v1095_v20 = vsub.f32 %v2387_v22, %v1093_v21 }
 0x4c6   : > { %v1098_v31 = vmul.f32 %v1096_v28, %v1096_v28 }
 0x4c7   : > { %v1097_v29 = vmul.f32 %v1095_v20, %v1095_v20 }
 0x4c8   : > { %v1102_v32 = vsel %vm840_vm2, %v1098_v31, 0.0 }
 0x4c9   : > { %v1099_v30 = vsel %vm840_vm2, %v1097_v29, 0.0 }
 0x4ca   : > { %1100 = vadd.xlane.f32.xlu1 %v1099_v30 }
 0x4ce   : > { %1103 = vadd.xlane.f32.xlu1 %v1102_v32 }
 0x557   : > { %v1101_v39 = vpop.xlane.xlu1 %1100 }
 0x558   : > { %v1105_v40 = vmul.f32 0.03125, %v1101_v39 }
 0x55a   : > { %v1107_v41 = vadd.f32 1e-05, %v1105_v40 }
 0x55b   : > { %v1104_v42 = vpop.xlane.xlu1 %1103 }
 0x55c   : > { %1970 = vrsqrt.f32 %v1107_v41  ;;  %v1106_v43 = vmul.f32 0.03125, %v1104_v42 }
 0x55e   : > { %v1108_v44 = vadd.f32 1e-05, %v1106_v43 }
 0x560   : > { %1972 = vrsqrt.f32 %v1108_v44 }
 0x566   : > { %v1971_v45 = vpop.eup %1970 }
 0x567   : > { %v1111_v46 = vmul.f32 %v1971_v45, %v1095_v20 }
 0x569   : > { %v1113_v47 = vmul.f32 %v2364_v48, %v1111_v46 }
 0x56a   : > { %v1973_v49 = vpop.eup %1972 }
 0x56b   : > { %v1112_v50 = vmul.f32 %v1973_v49, %v1096_v28  ;;  %v1115_v51 = vadd.f32 %v2372_v52, %v1113_v47 }
 0x56d   : > { %v1114_v53 = vmul.f32 %v2364_v48, %v1112_v50  ;;  %1797 = vmatprep.mubr.msk.f32.mxu0 %vm840_vm2, %v1115_v51  ;;  %v1223_v48 = vld [vmem:[%s2298_s23 + $0x20] sm:$0xff] }
 0x56e   : > { %v1870_v62 = vpack.c.bf16 %v1224_v61, %v1223_v48 }
 0x56f   : > { %v1116_v54 = vadd.f32 %v2372_v52, %v1114_v53  ;;  %v1225_v52 = vld [vmem:[%s2298_s23 + $0x30] sm:$0xff] }
 0x570   : > { %1871 = vmatprep.subr.bf16.mxu1 %v1870_v62  ;;  %v1874_v0 = vpack.c.bf16 %v1226_v63, %v1225_v52 }
 0x571   : > { %1798 = vmatmul.mubr.msk.f32.vlgmr.msra.gmra.mrb[4].mxu0 %vm840_vm2, %v1116_v54  ;;  %1873 = vmatpush3.bf16.msra.mxu1 %v1870_v62 }
 0x572   : > { %1875 = vmatprep.subr.bf16.mxu1 %v1874_v0 }
 0x575   : > { %1877 = vmatpush3.bf16.msra.mxu1 %v1874_v0 }
 0x644   : > { %v1799_v2 = vpop.f32.mrb[4].mxu0 }
 0x645   : > { %v1206_v3 = vadd.f32 %v1799_v2, %v1690_v1  ;;  %v1200_v4 = vpop.f32.mrb[5].mxu0 }
 0x646   : > { %v1201_v5 = vadd.f32 %v1690_v1, %v1200_v4 }
 0x647   : > { %v1212_v6 = vmul.f32 0.70710677, %v1206_v3  ;;  %v1210_v13 = vmul.f32 0.5, %v1206_v3 }
 0x648   : > { %v1211_v7 = vmul.f32 0.70710677, %v1201_v5  ;;  %v1209_v11 = vmul.f32 0.5, %v1201_v5 }
 0x649   : > { %1974 = verf.f32 %v1212_v6 }
 0x64a   : > { %1976 = verf.f32 %v1211_v7 }
 0x653   : > { %v1975_v8 = vpop.eup %1974 }
 0x654   : > { %v1977_v9 = vpop.eup %1976  ;;  %v1216_v10 = vadd.f32 1.0, %v1975_v8 }
 0x655   : > { %v1215_v12 = vadd.f32 1.0, %v1977_v9 }
 0x656   : > { %v1218_v15 = vmul.f32 %v1216_v10, %v1210_v13 }
 0x657   : > { %v1217_v14 = vmul.f32 %v1215_v12, %v1209_v11 }
 0x659   : > { %1816 = vmatprep.mubr.msk.f32.mxu1 %vm1234_vm4, %v1217_v14 }
 0x65a   : > { %1817 = vmatmul.mubr.msk.f32.vlgmr.msra.gmra.mrb[0].mxu1 %vm1234_vm4, %v1218_v15 }
 0x72b   : > { %1321 = sbr.rel (%p1696_p1) target bundleno = 1844 (0x734), region = 96 }
 0x72d   : > { %v1818_v17 = vpop.f32.mrb[0].mxu1 }
 0x72e   : > { %v1313_v18 = vadd.f32 %v1818_v17, %v1693_v16  ;;  %v1307_v23 = vpop.f32.mrb[1].mxu1 }
 0x72f   : > { %v1308_v24 = vadd.f32 %v1693_v16, %v1307_v23 }
 0x730   : > { %v1317_v25 = vadd.f32 %v1313_v18, %v2384_v19 }
 0x731   : > { %v1316_v26 = vadd.f32 %v1308_v24, %v2387_v22 }
 0x732   : > { %1323 = vst.msk [vmem:[#allocation2 + $0x8] sm:$0xff] %vm840_vm2, %v1317_v25 }
 0x733   : > { %1322 = vst.msk [vmem:[#allocation2] sm:$0xff] %vm840_vm2, %v1316_v26 }
 0x734 PF: > { %p1697_p2 = scmp.ne.s32.totalorder %s2060_s27, 1 }
 0x735   : > { %v1330_v27 = vsel (!%p1697_p2), %vm840_vm2, %v1316_v26, 0.0  ;;  %v1333_v21 = vsel (!%p1697_p2), %vm840_vm2, %v1317_v25, 0.0  ;;  %s2588_s23 = sld [smem:[#allocation25_spill]] (!%p1697_p2)  ;;  %s2589_s1 = sld [smem:[#allocation23_spill]] (!%p1697_p2) }
 0x736   : > { %1327 = sbr.rel (%p1697_p2) target bundleno = 2378 (0x94a), region = 100  ;;  %1331 = vadd.xlane.f32.xlu0 (!%p1697_p2), %v1330_v27  ;;  %s2590_s17 = sld [smem:[#allocation24_spill]] (!%p1697_p2) }
 0x737   : > { %s2591_s13 = sld [smem:[#allocation26_spill]] (!%p1697_p2) }
 0x73a   : > { %1334 = vadd.xlane.f32.xlu0 (!%p1697_p2), %v1333_v21 }
 0x73b   : > { %v1372_v35 = vld [vmem:[%s2588_s23] sm:$0xff] (!%p1697_p2)  ;;  %v1373_v36 = vld [vmem:[%s2588_s23 + $0x8] sm:$0xff] (!%p1697_p2)  ;;  %v1374_v37 = vld [vmem:[%s2588_s23 + $0x10] sm:$0xff] (!%p1697_p2) }
 0x73c   : > { %v1878_v38 = vpack.c.bf16 (!%p1697_p2), %v1373_v36, %v1372_v35  ;;  %v1375_v39 = vld [vmem:[%s2588_s23 + $0x18] sm:$0xff] (!%p1697_p2)  ;;  %v1698_v49 = vld [vmem:[%s2589_s1] ss:$0 sm:$0xff] (!%p1697_p2) }
 0x73d   : > { %v1882_v40 = vpack.c.bf16 %v1375_v39, %v1374_v37  ;;  %v1699_v51 = vld [vmem:[%s2590_s17] ss:$0 sm:$0xff] }
 0x73e   : > { %1879 = vmatprep.subr.bf16.mxu0 %v1878_v38  ;;  %v1700_v59 = vld [vmem:[%s2591_s13] ss:$0 sm:$0xff] }
 0x73f   : > { %1881 = vmatpush3.bf16.msra.mxu0 %v1878_v38 }
 0x740   : > { %1883 = vmatprep.subr.bf16.mxu0 %v1882_v40 }
 0x743   : > { %1885 = vmatpush3.bf16.msra.mxu0 %v1882_v40 }
 0x7c3   : > { %v1332_v19 = vpop.xlane.xlu0 %1331 }
 0x7c4   : > { %v1336_v28 = vmul.f32 0.03125, %v1332_v19 }
 0x7c6   : > { %v1338_v22 = vsub.f32 %v1316_v26, %v1336_v28 }
 0x7c7   : > { %v1335_v20 = vpop.xlane.xlu0 %1334 }
 0x7c8   : > { %v1337_v29 = vmul.f32 0.03125, %v1335_v20  ;;  %v1340_v30 = vmul.f32 %v1338_v22, %v1338_v22 }
 0x7ca   : > { %v1339_v31 = vsub.f32 %v1317_v25, %v1337_v29  ;;  %v1342_v32 = vsel %vm840_vm2, %v1340_v30, 0.0 }
 0x7cb   : > { %1343 = vadd.xlane.f32.xlu1 %v1342_v32 }
 0x7cc   : > { %v1341_v33 = vmul.f32 %v1339_v31, %v1339_v31 }
 0x7ce   : > { %v1345_v34 = vsel %vm840_vm2, %v1341_v33, 0.0 }
 0x7cf   : > { %1346 = vadd.xlane.f32.xlu1 %v1345_v34 }
 0x858   : > { %v1344_v41 = vpop.xlane.xlu1 %1343 }
 0x859   : > { %v1348_v42 = vmul.f32 0.03125, %v1344_v41 }
 0x85b   : > { %v1350_v43 = vadd.f32 1e-05, %v1348_v42 }
 0x85c   : > { %v1347_v44 = vpop.xlane.xlu1 %1346 }
 0x85d   : > { %1978 = vrsqrt.f32 %v1350_v43  ;;  %v1349_v45 = vmul.f32 0.03125, %v1347_v44 }
 0x85f   : > { %v1351_v46 = vadd.f32 1e-05, %v1349_v45 }
 0x861   : > { %1980 = vrsqrt.f32 %v1351_v46 }
 0x867   : > { %v1979_v47 = vpop.eup %1978 }
 0x868   : > { %v1354_v50 = vmul.f32 %v1979_v47, %v1338_v22 }
 0x86a   : > { %v1362_v53 = vmul.f32 %v1698_v49, %v1354_v50 }
 0x86b   : > { %v1981_v54 = vpop.eup %1980 }
 0x86c   : > { %v1355_v55 = vmul.f32 %v1981_v54, %v1339_v31  ;;  %v1370_v56 = vadd.f32 %v1699_v51, %v1362_v53 }
 0x86e   : > { %v1363_v57 = vmul.f32 %v1698_v49, %v1355_v55  ;;  %1827 = vmatprep.mubr.msk.f32.mxu0 %vm840_vm2, %v1370_v56 }
 0x870   : > { %v1371_v58 = vadd.f32 %v1699_v51, %v1363_v57 }
 0x872   : > { %1828 = vmatmul.mubr.msk.f32.vlgmr.msra.gmra.mrb[0].mxu0 %vm840_vm2, %v1371_v58 }
 0x945   : > { %v1829_v60 = vpop.f32.mrb[0].mxu0 }
 0x946   : > { %v1461_v48 = vadd.f32 %v1829_v60, %v1700_v59  ;;  %v1455_v61 = vpop.f32.mrb[1].mxu0 }
 0x947   : > { %v1456_v62 = vadd.f32 %v1700_v59, %v1455_v61 }
 0x948   : > { %1465 = vst [vmem:[%s2304_s18 + $0x8] sm:$0xff] %v1461_v48 }
 0x949   : > { %1464 = vst [vmem:[%s2304_s18] sm:$0xff] %v1456_v62 }
 0x94a PF: > { %s2592_s26 = sld [smem:[#allocation9_spill]]  ;;  %s2595_s21 = sld [smem:[#allocation27_spill]] }
 0x94b   : > { %s2593_s16 = sld [smem:[#allocation7_spill]]  ;;  %s1480_s24 = sshll.u32 %s2304_s18, 4  ;;  %s2467_s24 = int_to_ptr.vmem [resolvable:$true] %s1480_s24 }
 0x94c   : > { %s1982_s0 = scalar_lea.vmem %s2467_s24, 256  ;;  %s2079_s30 = smov [#allocation3]  }
 0x94d   : > { %p1983_p4 = scmp.ne.s32.totalorder %s2467_s24, %s1982_s0  ;;  %s1986_s1 = sshll.u32 %s2079_s30, 4  ;;  %s1987_s1 = int_to_ptr.vmem [resolvable:$false] %s1986_s1 }
 0x94e   : > { %s1988_s20 = scalar_lea.vmem %s1987_s1, 512  ;;  %p1989_p7 = scmp.lt.s32.totalorder %s2467_s24, %s1987_s1 }
 0x94f   : > { %p1984_p5 = pnand %p1983_p4, %p2221_p3  ;;  %p1990_p8 = scmp.lt.s32.totalorder %s1988_s20, %s1982_s0 }
 0x950   : > { %s1715_s27 = sshll.u32 %s2592_s26, 8 }
 0x951   : > { %s2464_s6 = scalar_lea.hbm %s2595_s21, %s1715_s27  ;;  %s2596_s7 = sand.u32 1, %s2593_s16  }
 0x952   : > { %s2471_s29 = scalar_lea.sflag [#allocation4], %s2596_s7  ;;  %p1985_p6 = pneg %p1984_p5 }
 0x953   : > { %p1991_p10 = por %p1990_p8, %p1989_p7 }
 0x955   : > { %p1992_p11 = pnand %p1991_p10, %p1985_p6 }
 0x957   : > { %1995 = shalt.err (!%p1992_p11)
}
 0x958   : > { %s1996_s18 = scalar_lea.hbm %s2464_s6, 256  ;;  %s2000_s14 = scalar_lea.hbm %s2595_s21, 512 }
 0x959   : > { %p1997_p12 = scmp.ne.s32.totalorder %s2464_s6, %s1996_s18  ;;  %p2001_p1 = scmp.lt.u32.totalorder %s2464_s6, %s2595_s21 }
 0x95a   : > { %p2002_p2 = scmp.lt.u32.totalorder %s2000_s14, %s1996_s18  ;;  %p2004_p5 = scmp.lt.u32.totalorder %s1996_s18, %s2464_s6 }
 0x95b   : > { %p1998_p13 = pnand %p1997_p12, %p2221_p3 }
 0x95c   : > { %p2003_p4 = por %p2002_p2, %p2001_p1 }
 0x95d   : > { %p1999_p0 = pneg %p1998_p13 }
 0x95e   : > { %p2005_p6 = por %p2004_p5, %p2003_p4 }
 0x960   : > { %p2006_p7 = pnand %p2005_p6, %p1999_p0 }
 0x962   : > { %2009 = shalt.err (!%p2006_p7)
}
 0x963   : > { %s2080_s26 = smov 128   ;;  %s2081_s16 = smov 8  }
 0x964   : > { %1886 = dma.vmem_to_hbm [thread:$0]  (%p2221_p3), %s2467_s24, 256, %s2464_s6, %s2471_s29, %s2080_s26, %s2080_s26, %s2081_s16  }
 0x965 PF: > { %s2597_s27 = sld [smem:[#allocation12_spill]]  ;;  %s2598_s22 = sld [smem:[#allocation6_spill]] }
 0x96b   : > { %p1892_p8 = scmp.ge.s32.totalorder %s2597_s27, 2  ;;  %s1495_s7 = sand.u32 1, %s2598_s22  }
 0x96c   : > { %s1496_s0 = scalar_lea.sflag [#allocation4], %s1495_s7 }
 0x96d   : > { %p1889_p10 = pnand %p1892_p8, %p2231_p9 }
 0x96f   : > { %2043 = dma.done.wait (!%p1889_p10), %s1496_s0, 256  }
 0x970   : > { %2045 = vsyncadd (!%p1889_p10), %s1496_s0, 4294967040  ;;  %s30_s30 = sadd.s32 1, %s2597_s27   ;;  %s2600_s24 = sld [smem:[#allocation7_spill]] }
 0x971   : > { %p27_p11 = scmp.ge.s32.totalorder %s30_s30, 6   ;;  %s2601_s25 = sld [smem:[#allocation8_spill]] }
 0x972   : > { %s2602_s26 = sld [smem:[#allocation17_spill]]  ;;  %s2603_s27 = sld [smem:[#allocation10_spill]] }
 0x973   : > { %s2604_s28 = sld [smem:[#allocation11_spill]]  ;;  %s2605_s29 = sld [smem:[#allocation13_spill]] }
 0x974   : > { %s2606_s0 = sld [smem:[#allocation15_spill]]  ;;  %29 = sbr.rel (!%p27_p11) target bundleno = 16 (0x10), region = 165 }
 0x97b   :  { %1501 = vsyncpa [#allocation4], 1 }
 0x97c   :  { %1503 = vsyncpa [#allocation4 + $0x1], 1 }

</bundles_post_ra>
